<compile_context>
chip_gen: v6e
topology: v6e:2x2x1
jax: 0.10.0
libtpu: 0.0.40
codegen_flags: <defaults>
</compile_context>

<pallas_src>
from functools import partial
from typing import NamedTuple, Optional

import jax
import jax.numpy as jnp
from jax.experimental import pallas as pl
from jax.experimental.pallas import tpu as pltpu


def _round_up(x: int, m: int) -> int:
    return ((x + m - 1) // m) * m


def _cdiv(a: int, b: int) -> int:
    return (a + b - 1) // b


def _tpu_vmem_capacity_bytes() -> int:
    """Physical VMEM per TensorCore; conservative 64 MiB (v7x) if unknown."""
    try:
        info = pltpu.get_tpu_info()
        cap = getattr(info, "vmem_capacity_bytes", None)
        if cap:
            return int(cap)
    except Exception:
        pass
    return 64 * 1024 * 1024


class DenseParams(NamedTuple):
    w_kn: jax.Array                 # (K_pad, N_pad) weight, N on lanes
    b2d: jax.Array                  # (1, N_pad) float32 bias
    in_dim: int
    out_dim: int
    matmul_dtype: Optional[object]  # e.g. jnp.bfloat16, or None for f32


def prepare_dense_params(weight, bias, *, matmul_dtype=None) -> DenseParams:
    """One-time parameter prep: pad to 128-multiples, transpose, (cast)."""
    N, K = weight.shape
    K_pad = _round_up(K, 128)
    N_pad = _round_up(N, 128)
    w = jnp.pad(weight, ((0, N_pad - N), (0, K_pad - K)))
    w_kn = jnp.transpose(w)                                  # (K_pad, N_pad)
    if matmul_dtype is not None:
        w_kn = w_kn.astype(matmul_dtype)
    b2d = jnp.pad(bias, (0, N_pad - N)).reshape(1, N_pad).astype(jnp.float32)
    return DenseParams(w_kn, b2d, K, N, matmul_dtype)


def _dense_kernel(x_ref, w_ref, b_ref, o_ref, *, matmul_dtype):
    # x_ref: (tm, K_pad)   activation tile (source dtype)
    # w_ref: (K_pad, tn)   pre-transposed weight tile (matmul dtype)
    # b_ref: (1, tn)       f32 bias tile
    # o_ref: (tm, tn)      lane-dense output tile
    x = x_ref[...]
    if matmul_dtype is not None:
        x = x.astype(matmul_dtype)   # cheap VPU cast; x DMA stays f32
    acc = jax.lax.dot_general(
        x, w_ref[...],
        dimension_numbers=(((1,), (0,)), ((), ())),   # standard (M,K)x(K,N)
        preferred_element_type=jnp.float32,
    )
    o_ref[...] = (acc + b_ref[...]).astype(o_ref.dtype)


def dense_forward(x, params: DenseParams, *, block_b=None,
                  allow_tiny_fallback=False):
    """Pallas equivalent of Dense.forward.  Returns (B, output_dim, 1, 1)."""
    B, K = x.shape
    assert K == params.in_dim, (K, params.in_dim)
    K_pad, N_pad = params.w_kn.shape
    N = params.out_dim
    out_dtype = x.dtype

    if allow_tiny_fallback and B * max(K_pad, N_pad) <= 16 * 1024:
        # Few-KB problem: pallas_call fixed overhead dominates -- let XLA fuse.
        xi = x.astype(params.w_kn.dtype) if params.matmul_dtype is not None else x
        acc = jnp.dot(xi, params.w_kn[:K], preferred_element_type=jnp.float32)
        y = (acc + params.b2d).astype(out_dtype)[:, :N]
        return y.reshape(B, N, 1, 1)

    x_bytes = jnp.dtype(x.dtype).itemsize
    w_bytes = jnp.dtype(params.w_kn.dtype).itemsize
    out_bytes = jnp.dtype(out_dtype).itemsize

    # ---- Generation-aware VMEM policy ------------------------------------
    capacity = _tpu_vmem_capacity_bytes()
    if capacity >= 100 * 1024 * 1024:       # v5e / v6e: 128 MiB physical
        budget = 96 * 1024 * 1024
        tm_cap = 1024
    else:                                    # v7x: 64 MiB physical
        budget = 44 * 1024 * 1024
        tm_cap = 512

    # bf16 MXU feed packs 16 rows per vreg sublane group.
    row_align = 16 if params.matmul_dtype == jnp.bfloat16 else 8

    # ---- Batch tile: balance ragged B instead of a fixed max tile --------
    if block_b is not None:
        tm = _round_up(min(block_b, max(B, 1)), row_align)
    else:
        n_b_guess = max(1, _cdiv(B, tm_cap))
        tm = _round_up(_cdiv(B, n_b_guess), row_align)

    # ---- N tile: split when the batch axis has only one tile (2-TC v7x) --
    tn = N_pad
    if _cdiv(B, tm) == 1 and N_pad >= 512 and N_pad % 256 == 0:
        tn = N_pad // 2

    def _vmem_est(tm_, tn_):
        n_b_ = _cdiv(B, tm_)
        n_n_ = N_pad // tn_
        bufs_x = 1 if n_b_ == 1 else 2       # constant-index blocks -> 1 buffer
        bufs_w = 1 if n_n_ == 1 else 2
        return (bufs_x * tm_ * K_pad * x_bytes
                + bufs_w * K_pad * tn_ * w_bytes
                + bufs_w * tn_ * 4
                + 2 * tm_ * tn_ * out_bytes)

    while _vmem_est(tm, tn) > budget:
        if tm > row_align:
            tm = _round_up(max(row_align, tm // 2), row_align)   # keep (8,128)
        elif tn > 128 and (tn // 2) % 128 == 0:
            tn //= 2
        else:
            # TODO(synk): add a K-tiled accumulator fallback for Dense layers
            # whose single weight tile alone exceeds the VMEM budget.
            break

    n_b_tiles = _cdiv(B, tm)
    n_n_tiles = N_pad // tn
    B_pad = n_b_tiles * tm

    x_in = x
    if B_pad != B or K_pad != K:
        x_in = jnp.pad(x, ((0, B_pad - B), (0, K_pad - K)))

    est = _vmem_est(tm, tn)
    vmem_limit = max(int(1.2 * est) + 4 * 1024 * 1024, 16 * 1024 * 1024)
    vmem_limit = min(vmem_limit, int(0.9 * capacity))

    kernel = partial(_dense_kernel, matmul_dtype=params.matmul_dtype)

    def _run(single_buffer_constants: bool):
        def spec(shape, index_map, constant):
            if single_buffer_constants and constant:
                return pl.BlockSpec(shape, index_map,
                                    pipeline_mode=pl.Buffered(1))
            return pl.BlockSpec(shape, index_map)

        return pl.pallas_call(
            kernel,
            out_shape=jax.ShapeDtypeStruct((B_pad, N_pad), out_dtype),
            grid_spec=pltpu.PrefetchScalarGridSpec(
                num_scalar_prefetch=0,
                grid=(n_b_tiles, n_n_tiles),
                in_specs=[
                    spec((tm, K_pad), lambda i, j: (i, 0), n_b_tiles == 1),
                    spec((K_pad, tn), lambda i, j: (0, j), n_n_tiles == 1),
                    spec((1, tn), lambda i, j: (0, j), n_n_tiles == 1),
                ],
                out_specs=pl.BlockSpec((tm, tn), lambda i, j: (i, j)),
            ),
            compiler_params=pltpu.CompilerParams(
                dimension_semantics=("parallel", "parallel"),
                vmem_limit_bytes=vmem_limit,
            ),
        )(x_in, params.w_kn, params.b2d)

    try:
        y = _run(True)
    except Exception:
        # pl.Buffered(1) hint rejected by this jax build; default double
        # buffering is correctness-equivalent, so retry without the hint.
        y = _run(False)

    # Strip padding; trailing (1, 1) spatial dims are metadata-only.
    return y[:B, :N].reshape(B, N, 1, 1)


if __name__ == "__main__":
    key = jax.random.PRNGKey(0)

    def make_case(k, B, input_dim, output_dim):
        k_x, k_w, k_b = jax.random.split(k, 3)
        bound = 1.0 / (input_dim ** 0.5)
        x = jax.random.normal(k_x, (B, input_dim), dtype=jnp.float32)
        weight = jax.random.uniform(
            k_w, (output_dim, input_dim), minval=-bound, maxval=bound,
            dtype=jnp.float32)
        bias = jax.random.uniform(
            k_b, (output_dim,), minval=-bound, maxval=bound, dtype=jnp.float32)
        return x, weight, bias

    def ref_dense(x, weight, bias):
        return (x @ weight.T + bias)[:, :, None, None]

    k0, k1, k2 = jax.random.split(key, 3)

    # Case 1: the module's typical tiny shapes (time embedding -> channels).
    x, w, b = make_case(k0, B=2, input_dim=32, output_dim=16)
    ref = ref_dense(x, w, b)
    params = prepare_dense_params(w, b)
    out = jax.block_until_ready(dense_forward(x, params))
    assert out.shape == (2, 16, 1, 1), out.shape
    assert jnp.allclose(out, ref, atol=1e-4, rtol=1e-4)

    # bf16-fed MXU path (weight stored bf16 at init, x cast in-kernel).
    params_bf16 = prepare_dense_params(w, b, matmul_dtype=jnp.bfloat16)
    out_bf16 = jax.block_until_ready(dense_forward(x, params_bf16))
    assert out_bf16.shape == (2, 16, 1, 1), out_bf16.shape
    assert jnp.allclose(out_bf16, ref, atol=3e-2, rtol=3e-2)

    # Case 2: ragged B with a multi-tile batch grid (resident single-buffered
    # weight/bias, double-buffered x tiles, zero-padded last batch tile).
    x2, w2, b2 = make_case(k1, B=300, input_dim=96, output_dim=192)
    ref2 = ref_dense(x2, w2, b2)
    params2 = prepare_dense_params(w2, b2)
    out2 = jax.block_until_ready(dense_forward(x2, params2, block_b=128))
    assert out2.shape == (300, 192, 1, 1), out2.shape
    assert jnp.allclose(out2, ref2, atol=1e-4, rtol=1e-4)

    # Case 3: small B, wide N -> N splits into a second parallel grid axis
    # (both v7x TensorCores get work).
    x3, w3, b3 = make_case(k2, B=4, input_dim=64, output_dim=512)
    ref3 = ref_dense(x3, w3, b3)
    params3 = prepare_dense_params(w3, b3)
    out3 = jax.block_until_ready(dense_forward(x3, params3))
    assert out3.shape == (4, 512, 1, 1), out3.shape
    assert jnp.allclose(out3, ref3, atol=1e-4, rtol=1e-4)

    print("KERNEL_OK")
</pallas_src>

<mosaic_0001>
module attributes {stable_mosaic.version = 11 : i64} {
  func.func @_dense_kernel(%arg0: i32, %arg1: i32, %arg2: memref<8x128xf32, #tpu.memory_space<vmem>>, %arg3: memref<128x128xf32, #tpu.memory_space<vmem>>, %arg4: memref<1x128xf32, #tpu.memory_space<vmem>>, %arg5: memref<8x128xf32, #tpu.memory_space<vmem>>) attributes {dimension_semantics = [#tpu.dimension_semantics<parallel>, #tpu.dimension_semantics<parallel>], iteration_bounds = array<i64: 1, 1>, scalar_prefetch = 0 : i64, scratch_operands = 0 : i64, tpu.core_type = #tpu.core_type<tc>, window_params = [{pipeline_mode = #tpu.pipeline_mode<synchronous>, transform_indices = @transform_0, window_bounds = array<i64: 8, 128>}, {pipeline_mode = #tpu.pipeline_mode<synchronous>, transform_indices = @transform_1, window_bounds = array<i64: 128, 128>}, {pipeline_mode = #tpu.pipeline_mode<synchronous>, transform_indices = @transform_2, window_bounds = array<i64: 1, 128>}, {transform_indices = @transform_3, window_bounds = array<i64: 8, 128>}]} {
    %c0 = arith.constant 0 : index
    %c0_0 = arith.constant 0 : index
    %0 = vector.load %arg2[%c0, %c0_0] : memref<8x128xf32, #tpu.memory_space<vmem>>, vector<8x128xf32>
    %c0_1 = arith.constant 0 : index
    %c0_2 = arith.constant 0 : index
    %1 = vector.load %arg3[%c0_1, %c0_2] : memref<128x128xf32, #tpu.memory_space<vmem>>, vector<128x128xf32>
    %cst = arith.constant dense<0.000000e+00> : vector<8x128xf32>
    %2 = tpu.matmul %0, %1, %cst {dimension_numbers = #tpu.dot_dimension_numbers<[1], [0], [0], [1], [0, 0, 1, 1], [], []>} : vector<8x128xf32>, vector<128x128xf32>, vector<8x128xf32> -> vector<8x128xf32>
    %c0_3 = arith.constant 0 : index
    %c0_4 = arith.constant 0 : index
    %3 = vector.load %arg4[%c0_3, %c0_4] : memref<1x128xf32, #tpu.memory_space<vmem>>, vector<1x128xf32>
    %4 = vector.broadcast %3 : vector<1x128xf32> to vector<8x128xf32>
    %5 = arith.addf %2, %4 : vector<8x128xf32>
    %c0_5 = arith.constant 0 : index
    %c0_6 = arith.constant 0 : index
    %6 = vector.load %arg5[%c0_5, %c0_6] : memref<8x128xf32, #tpu.memory_space<vmem>>, vector<8x128xf32>
    tpu.vector_store %arg5[%c0_5, %c0_6], %5 {strides = array<i32>} : memref<8x128xf32, #tpu.memory_space<vmem>>, vector<8x128xf32>,
    return
  }
  func.func @transform_0(%arg0: i32, %arg1: i32) -> (i32, i32) {
    %c0_i32 = arith.constant 0 : i32
    %c0_i32_0 = arith.constant 0 : i32
    return %arg0, %c0_i32 : i32, i32
  }
  func.func @transform_1(%arg0: i32, %arg1: i32) -> (i32, i32) {
    %c0_i32 = arith.constant 0 : i32
    %c0_i32_0 = arith.constant 0 : i32
    return %c0_i32, %arg1 : i32, i32
  }
  func.func @transform_2(%arg0: i32, %arg1: i32) -> (i32, i32) {
    %c0_i32 = arith.constant 0 : i32
    %c0_i32_0 = arith.constant 0 : i32
    return %c0_i32, %arg1 : i32, i32
  }
  func.func @transform_3(%arg0: i32, %arg1: i32) -> (i32, i32) {
    %c0_i32 = arith.constant 0 : i32
    return %arg0, %arg1 : i32, i32
  }
}

module attributes {stable_mosaic.version = 11 : i64} {
  func.func @_dense_kernel(%arg0: i32, %arg1: i32, %arg2: memref<8x128xf32, #tpu.memory_space<vmem>>, %arg3: memref<128x128xf32, #tpu.memory_space<vmem>>, %arg4: memref<1x128xf32, #tpu.memory_space<vmem>>, %arg5: memref<8x128xf32, #tpu.memory_space<vmem>>) attributes {dimension_semantics = [#tpu.dimension_semantics<parallel>, #tpu.dimension_semantics<parallel>], iteration_bounds = array<i64: 1, 1>, scalar_prefetch = 0 : i64, scratch_operands = 0 : i64, tpu.core_type = #tpu.core_type<tc>, window_params = [{transform_indices = @transform_0, window_bounds = array<i64: 8, 128>}, {transform_indices = @transform_1, window_bounds = array<i64: 128, 128>}, {transform_indices = @transform_2, window_bounds = array<i64: 1, 128>}, {transform_indices = @transform_3, window_bounds = array<i64: 8, 128>}]} {
    %c0 = arith.constant 0 : index
    %c0_0 = arith.constant 0 : index
    %0 = vector.load %arg2[%c0, %c0_0] : memref<8x128xf32, #tpu.memory_space<vmem>>, vector<8x128xf32>
    %c0_1 = arith.constant 0 : index
    %c0_2 = arith.constant 0 : index
    %1 = vector.load %arg3[%c0_1, %c0_2] : memref<128x128xf32, #tpu.memory_space<vmem>>, vector<128x128xf32>
    %cst = arith.constant dense<0.000000e+00> : vector<8x128xf32>
    %2 = tpu.matmul %0, %1, %cst {dimension_numbers = #tpu.dot_dimension_numbers<[1], [0], [0], [1], [0, 0, 1, 1], [], []>} : vector<8x128xf32>, vector<128x128xf32>, vector<8x128xf32> -> vector<8x128xf32>
    %c0_3 = arith.constant 0 : index
    %c0_4 = arith.constant 0 : index
    %3 = vector.load %arg4[%c0_3, %c0_4] : memref<1x128xf32, #tpu.memory_space<vmem>>, vector<1x128xf32>
    %4 = vector.broadcast %3 : vector<1x128xf32> to vector<8x128xf32>
    %5 = arith.addf %2, %4 : vector<8x128xf32>
    %c0_5 = arith.constant 0 : index
    %c0_6 = arith.constant 0 : index
    %6 = vector.load %arg5[%c0_5, %c0_6] : memref<8x128xf32, #tpu.memory_space<vmem>>, vector<8x128xf32>
    tpu.vector_store %arg5[%c0_5, %c0_6], %5 {strides = array<i32>} : memref<8x128xf32, #tpu.memory_space<vmem>>, vector<8x128xf32>,
    return
  }
  func.func @transform_0(%arg0: i32, %arg1: i32) -> (i32, i32) {
    %c0_i32 = arith.constant 0 : i32
    %c0_i32_0 = arith.constant 0 : i32
    return %arg0, %c0_i32 : i32, i32
  }
  func.func @transform_1(%arg0: i32, %arg1: i32) -> (i32, i32) {
    %c0_i32 = arith.constant 0 : i32
    %c0_i32_0 = arith.constant 0 : i32
    return %c0_i32, %arg1 : i32, i32
  }
  func.func @transform_2(%arg0: i32, %arg1: i32) -> (i32, i32) {
    %c0_i32 = arith.constant 0 : i32
    %c0_i32_0 = arith.constant 0 : i32
    return %c0_i32, %arg1 : i32, i32
  }
  func.func @transform_3(%arg0: i32, %arg1: i32) -> (i32, i32) {
    %c0_i32 = arith.constant 0 : i32
    return %arg0, %arg1 : i32, i32
  }
}

</mosaic_0001>

<bundles_post_ra>
// kernel: tpu_custom_call.1
= control target key start
LH: loop header
LB: loop body
LE: loop exit
PB: predicated region body
PF: predicated region fallthrough
CT: control target
= control target key end

     0   :  { %8 = vsyncpa [#allocation3], 0  ;;  %s317_s0 = inlined_call_operand.hbm [shape: f32[8,128], index: 0, kind: input, shape index: {}]   ;;  %s318_s1 = inlined_call_operand.hbm [shape: f32[128,128], index: 1, kind: input, shape index: {}]   ;;  %s319_s2 = inlined_call_operand.vmem [shape: f32[1,128], index: 2, kind: input, shape index: {}]   ;;  %s320_s3 = inlined_call_operand.hbm [shape: f32[8,128], index: 3, kind: output, shape index: {}]  }
   0x1   :  { %9 = vsyncpa [#allocation6], 0 }
   0x2   :  { %10 = vsyncpa [#allocation4], 0  ;;  %s278_s12 = smov [#allocation2]   ;;  %s279_s14 = smov [#allocation5]  }
   0x3   :  { %s17_s13 = sshll.u32 %s278_s12, 4  ;;  %s26_s15 = sshll.u32 %s279_s14, 4  ;;  %s18_s13 = int_to_ptr.vmem [resolvable:$true] %s17_s13  ;;  %s27_s15 = int_to_ptr.vmem [resolvable:$true] %s26_s15 }
   0x4   :  { %s220_s16 = scalar_lea.vmem %s18_s13, 128  ;;  %p225_p1 = scmp.lt.s32.totalorder %s18_s13, %s18_s13 }
   0x5   :  { %p221_p0 = scmp.ne.s32.totalorder %s18_s13, %s220_s16  ;;  %p226_p2 = scmp.lt.s32.totalorder %s220_s16, %s220_s16 }
   0x7   :  { %p227_p3 = por %p226_p2, %p225_p1 }
   0x9   :  { %p228_p4 = pnand %p227_p3, %p221_p0 }
   0xb   :  { %231 = shalt.err (!%p228_p4)
}
   0xc   :  { %20 = dma.hbm_to_vmem [thread:$0]  %s317_s0, 128, %s18_s13, [#allocation3]  }
   0xd   :  { %s240_s19 = scalar_lea.vmem %s27_s15, 2048  ;;  %p245_p6 = scmp.lt.s32.totalorder %s27_s15, %s27_s15 }
   0xe   :  { %p241_p5 = scmp.ne.s32.totalorder %s27_s15, %s240_s19  ;;  %p246_p7 = scmp.lt.s32.totalorder %s240_s19, %s240_s19 }
  0x10   :  { %p247_p8 = por %p246_p7, %p245_p6 }
  0x12   :  { %p248_p9 = pnand %p247_p8, %p241_p5 }
  0x14   :  { %251 = shalt.err (!%p248_p9)
}
  0x15   :  { %s280_s20 = smov 128   ;;  %s281_s21 = smov 8  }
  0x16   :  { %32 = dma.hbm_to_vmem [thread:$0]  %s318_s1, 2048, %s27_s15, [#allocation6], %s280_s20, %s280_s20, %s281_s21  }
  0x17   :  { %272 = dma.done.wait [#allocation3], 128  }
  0x18   :  { %273 = vsyncadd [#allocation3], 4294967168 }
  0x19   :  { %274 = dma.done.wait [#allocation6], 2048  }
  0x1a   :  { %275 = vsyncadd [#allocation6], 4294965248  ;;  %v282_v0 = vmov 0.0   ;;  %vm283_vm0 = vmmov 0   ;;  %v57_v1 = vld [vmem:[#allocation5 + $0x78] sm:$0xff]  ;;  %v56_v2 = vld [vmem:[#allocation5 + $0x70] sm:$0xff] }
  0x1b   :  { %170 = vmatprep.subr.mxu0 %v282_v0  ;;  %202 = vmatprep.mubr.msk.f32.mxu0 %vm283_vm0, %v282_v0  ;;  %v55_v3 = vld [vmem:[#allocation5 + $0x68] sm:$0xff]  ;;  %v54_v4 = vld [vmem:[#allocation5 + $0x60] sm:$0xff]  ;;  %v53_v5 = vld [vmem:[#allocation5 + $0x58] sm:$0xff]  ;;  %s284_s24 = smov [#allocation7]  }
  0x1c   :  { %171 = vmatpush3.msra.mxu0 %v57_v1  ;;  %v52_v6 = vld [vmem:[#allocation5 + $0x50] sm:$0xff]  ;;  %v51_v7 = vld [vmem:[#allocation5 + $0x48] sm:$0xff]  ;;  %v50_v8 = vld [vmem:[#allocation5 + $0x40] sm:$0xff]  ;;  %s142_s25 = sshll.u32 %s284_s24, 4  ;;  %s143_s25 = int_to_ptr.vmem [resolvable:$true] %s142_s25 }
  0x1d   :  { %172 = vmatprep.subr.mxu0 %v282_v0  ;;  %v49_v9 = vld [vmem:[#allocation5 + $0x38] sm:$0xff]  ;;  %v48_v10 = vld [vmem:[#allocation5 + $0x30] sm:$0xff]  ;;  %v47_v11 = vld [vmem:[#allocation5 + $0x28] sm:$0xff]  ;;  %s252_s26 = scalar_lea.vmem %s143_s25, 128  ;;  %p257_p11 = scmp.lt.s32.totalorder %s143_s25, %s143_s25 }
  0x1e   :  { %173 = vmatpush3.msra.mxu0 %v56_v2  ;;  %v46_v12 = vld [vmem:[#allocation5 + $0x20] sm:$0xff]  ;;  %v45_v13 = vld [vmem:[#allocation5 + $0x18] sm:$0xff]  ;;  %v44_v14 = vld [vmem:[#allocation5 + $0x10] sm:$0xff]  ;;  %p253_p10 = scmp.ne.s32.totalorder %s143_s25, %s252_s26  ;;  %p258_p12 = scmp.lt.s32.totalorder %s252_s26, %s252_s26 }
  0x1f   :  { %174 = vmatprep.subr.mxu0 %v282_v0  ;;  %v43_v15 = vld [vmem:[#allocation5 + $0x8] sm:$0xff]  ;;  %v42_v16 = vld [vmem:[#allocation5] sm:$0xff]  ;;  %v41_v17 = vld [vmem:[#allocation2] sm:$0xff] }
  0x20   :  { %175 = vmatpush3.msra.mxu0 %v55_v3  ;;  %v152_v18 = vld [vmem:[%s319_s2] ss:$0 sm:$0xff]  ;;  %p259_p13 = por %p258_p12, %p257_p11 }
  0x21   :  { %176 = vmatprep.subr.mxu0 %v282_v0 }
  0x22   :  { %177 = vmatpush3.msra.mxu0 %v54_v4  ;;  %p260_p0 = pnand %p259_p13, %p253_p10 }
  0x23   :  { %178 = vmatprep.subr.mxu0 %v282_v0 }
  0x24   :  { %179 = vmatpush3.msra.mxu0 %v53_v5 }
  0x25   :  { %180 = vmatprep.subr.mxu0 %v282_v0 }
  0x26   :  { %181 = vmatpush3.msra.mxu0 %v52_v6 }
  0x27   :  { %182 = vmatprep.subr.mxu0 %v282_v0 }
  0x28   :  { %183 = vmatpush3.msra.mxu0 %v51_v7 }
  0x29   :  { %184 = vmatprep.subr.mxu0 %v282_v0 }
  0x2a   :  { %185 = vmatpush3.msra.mxu0 %v50_v8 }
  0x2b   :  { %186 = vmatprep.subr.mxu0 %v282_v0 }
  0x2c   :  { %187 = vmatpush3.msra.mxu0 %v49_v9 }
  0x2d   :  { %188 = vmatprep.subr.mxu0 %v282_v0 }
  0x2e   :  { %189 = vmatpush3.msra.mxu0 %v48_v10 }
  0x2f   :  { %190 = vmatprep.subr.mxu0 %v282_v0 }
  0x30   :  { %191 = vmatpush3.msra.mxu0 %v47_v11 }
  0x31   :  { %192 = vmatprep.subr.mxu0 %v282_v0 }
  0x32   :  { %193 = vmatpush3.msra.mxu0 %v46_v12 }
  0x33   :  { %194 = vmatprep.subr.mxu0 %v282_v0 }
  0x34   :  { %195 = vmatpush3.msra.mxu0 %v45_v13 }
  0x35   :  { %196 = vmatprep.subr.mxu0 %v282_v0 }
  0x36   :  { %197 = vmatpush3.msra.mxu0 %v44_v14 }
  0x37   :  { %198 = vmatprep.subr.mxu0 %v282_v0 }
  0x38   :  { %199 = vmatpush3.msra.mxu0 %v43_v15 }
  0x39   :  { %200 = vmatprep.subr.mxu0 %v282_v0 }
  0x3a   :  { %201 = vmatpush3.msra.mxu0 %v42_v16 }
  0x3b   :  { %203 = vmatmul.mubr.f32.vlgmr.msra.gmra.mxu0 %v41_v17 }
  0xfb   :  { %v131_v19 = vpop.f32.mrf.mxu0 }
  0xfc   :  { %v132_v20 = vadd.f32 %v152_v18, %v131_v19 }
  0xfd   :  { %v204_v21 = vpop.f32.mrf.mxu0 }
  0xfe   :  { %135 = vst [vmem:[#allocation7] sm:$0xff] %v132_v20 }
  0xff   :  { %263 = shalt.err (!%p260_p0)
}
 0x100   :  { %145 = dma.vmem_to_hbm [thread:$0]  %s143_s25, 128, %s320_s3, [#allocation4]  }
 0x101   :  { %276 = dma.done.wait [#allocation4], 128  }
 0x102   :  { %277 = vsyncadd [#allocation4], 4294967168 }
 0x103   :  { %149 = vsyncpa [#allocation3], 1 }
 0x104   :  { %150 = vsyncpa [#allocation6], 1 }
 0x105   :  { %151 = vsyncpa [#allocation4], 1 }

// kernel: tpu_custom_call.1
= control target key start
LH: loop header
LB: loop body
LE: loop exit
PB: predicated region body
PF: predicated region fallthrough
CT: control target
= control target key end

     0   :  { %8 = vsyncpa [#allocation3], 0  ;;  %s317_s0 = inlined_call_operand.hbm [shape: f32[8,128], index: 0, kind: input, shape index: {}]   ;;  %s318_s1 = inlined_call_operand.hbm [shape: f32[128,128], index: 1, kind: input, shape index: {}]   ;;  %s319_s2 = inlined_call_operand.vmem [shape: f32[1,128], index: 2, kind: input, shape index: {}]   ;;  %s320_s3 = inlined_call_operand.hbm [shape: f32[8,128], index: 3, kind: output, shape index: {}]  }
   0x1   :  { %9 = vsyncpa [#allocation6], 0 }
   0x2   :  { %10 = vsyncpa [#allocation4], 0  ;;  %s278_s12 = smov [#allocation2]   ;;  %s279_s14 = smov [#allocation5]  }
   0x3   :  { %s17_s13 = sshll.u32 %s278_s12, 4  ;;  %s26_s15 = sshll.u32 %s279_s14, 4  ;;  %s18_s13 = int_to_ptr.vmem [resolvable:$true] %s17_s13  ;;  %s27_s15 = int_to_ptr.vmem [resolvable:$true] %s26_s15 }
   0x4   :  { %s220_s16 = scalar_lea.vmem %s18_s13, 128  ;;  %p225_p1 = scmp.lt.s32.totalorder %s18_s13, %s18_s13 }
   0x5   :  { %p221_p0 = scmp.ne.s32.totalorder %s18_s13, %s220_s16  ;;  %p226_p2 = scmp.lt.s32.totalorder %s220_s16, %s220_s16 }
   0x7   :  { %p227_p3 = por %p226_p2, %p225_p1 }
   0x9   :  { %p228_p4 = pnand %p227_p3, %p221_p0 }
   0xb   :  { %231 = shalt.err (!%p228_p4)
}
   0xc   :  { %20 = dma.hbm_to_vmem [thread:$0]  %s317_s0, 128, %s18_s13, [#allocation3]  }
   0xd   :  { %s240_s19 = scalar_lea.vmem %s27_s15, 2048  ;;  %p245_p6 = scmp.lt.s32.totalorder %s27_s15, %s27_s15 }
   0xe   :  { %p241_p5 = scmp.ne.s32.totalorder %s27_s15, %s240_s19  ;;  %p246_p7 = scmp.lt.s32.totalorder %s240_s19, %s240_s19 }
  0x10   :  { %p247_p8 = por %p246_p7, %p245_p6 }
  0x12   :  { %p248_p9 = pnand %p247_p8, %p241_p5 }
  0x14   :  { %251 = shalt.err (!%p248_p9)
}
  0x15   :  { %s280_s20 = smov 128   ;;  %s281_s21 = smov 8  }
  0x16   :  { %32 = dma.hbm_to_vmem [thread:$0]  %s318_s1, 2048, %s27_s15, [#allocation6], %s280_s20, %s280_s20, %s281_s21  }
  0x17   :  { %272 = dma.done.wait [#allocation3], 128  }
  0x18   :  { %273 = vsyncadd [#allocation3], 4294967168 }
  0x19   :  { %274 = dma.done.wait [#allocation6], 2048  }
  0x1a   :  { %275 = vsyncadd [#allocation6], 4294965248  ;;  %v282_v0 = vmov 0.0   ;;  %vm283_vm0 = vmmov 0   ;;  %v57_v1 = vld [vmem:[#allocation5 + $0x78] sm:$0xff]  ;;  %v56_v2 = vld [vmem:[#allocation5 + $0x70] sm:$0xff] }
  0x1b   :  { %170 = vmatprep.subr.mxu0 %v282_v0  ;;  %202 = vmatprep.mubr.msk.f32.mxu0 %vm283_vm0, %v282_v0  ;;  %v55_v3 = vld [vmem:[#allocation5 + $0x68] sm:$0xff]  ;;  %v54_v4 = vld [vmem:[#allocation5 + $0x60] sm:$0xff]  ;;  %v53_v5 = vld [vmem:[#allocation5 + $0x58] sm:$0xff]  ;;  %s284_s24 = smov [#allocation7]  }
  0x1c   :  { %171 = vmatpush3.msra.mxu0 %v57_v1  ;;  %v52_v6 = vld [vmem:[#allocation5 + $0x50] sm:$0xff]  ;;  %v51_v7 = vld [vmem:[#allocation5 + $0x48] sm:$0xff]  ;;  %v50_v8 = vld [vmem:[#allocation5 + $0x40] sm:$0xff]  ;;  %s142_s25 = sshll.u32 %s284_s24, 4  ;;  %s143_s25 = int_to_ptr.vmem [resolvable:$true] %s142_s25 }
  0x1d   :  { %172 = vmatprep.subr.mxu0 %v282_v0  ;;  %v49_v9 = vld [vmem:[#allocation5 + $0x38] sm:$0xff]  ;;  %v48_v10 = vld [vmem:[#allocation5 + $0x30] sm:$0xff]  ;;  %v47_v11 = vld [vmem:[#allocation5 + $0x28] sm:$0xff]  ;;  %s252_s26 = scalar_lea.vmem %s143_s25, 128  ;;  %p257_p11 = scmp.lt.s32.totalorder %s143_s25, %s143_s25 }
  0x1e   :  { %173 = vmatpush3.msra.mxu0 %v56_v2  ;;  %v46_v12 = vld [vmem:[#allocation5 + $0x20] sm:$0xff]  ;;  %v45_v13 = vld [vmem:[#allocation5 + $0x18] sm:$0xff]  ;;  %v44_v14 = vld [vmem:[#allocation5 + $0x10] sm:$0xff]  ;;  %p253_p10 = scmp.ne.s32.totalorder %s143_s25, %s252_s26  ;;  %p258_p12 = scmp.lt.s32.totalorder %s252_s26, %s252_s26 }
  0x1f   :  { %174 = vmatprep.subr.mxu0 %v282_v0  ;;  %v43_v15 = vld [vmem:[#allocation5 + $0x8] sm:$0xff]  ;;  %v42_v16 = vld [vmem:[#allocation5] sm:$0xff]  ;;  %v41_v17 = vld [vmem:[#allocation2] sm:$0xff] }
  0x20   :  { %175 = vmatpush3.msra.mxu0 %v55_v3  ;;  %v152_v18 = vld [vmem:[%s319_s2] ss:$0 sm:$0xff]  ;;  %p259_p13 = por %p258_p12, %p257_p11 }
  0x21   :  { %176 = vmatprep.subr.mxu0 %v282_v0 }
  0x22   :  { %177 = vmatpush3.msra.mxu0 %v54_v4  ;;  %p260_p0 = pnand %p259_p13, %p253_p10 }
  0x23   :  { %178 = vmatprep.subr.mxu0 %v282_v0 }
  0x24   :  { %179 = vmatpush3.msra.mxu0 %v53_v5 }
  0x25   :  { %180 = vmatprep.subr.mxu0 %v282_v0 }
  0x26   :  { %181 = vmatpush3.msra.mxu0 %v52_v6 }
  0x27   :  { %182 = vmatprep.subr.mxu0 %v282_v0 }
  0x28   :  { %183 = vmatpush3.msra.mxu0 %v51_v7 }
  0x29   :  { %184 = vmatprep.subr.mxu0 %v282_v0 }
  0x2a   :  { %185 = vmatpush3.msra.mxu0 %v50_v8 }
  0x2b   :  { %186 = vmatprep.subr.mxu0 %v282_v0 }
  0x2c   :  { %187 = vmatpush3.msra.mxu0 %v49_v9 }
  0x2d   :  { %188 = vmatprep.subr.mxu0 %v282_v0 }
  0x2e   :  { %189 = vmatpush3.msra.mxu0 %v48_v10 }
  0x2f   :  { %190 = vmatprep.subr.mxu0 %v282_v0 }
  0x30   :  { %191 = vmatpush3.msra.mxu0 %v47_v11 }
  0x31   :  { %192 = vmatprep.subr.mxu0 %v282_v0 }
  0x32   :  { %193 = vmatpush3.msra.mxu0 %v46_v12 }
  0x33   :  { %194 = vmatprep.subr.mxu0 %v282_v0 }
  0x34   :  { %195 = vmatpush3.msra.mxu0 %v45_v13 }
  0x35   :  { %196 = vmatprep.subr.mxu0 %v282_v0 }
  0x36   :  { %197 = vmatpush3.msra.mxu0 %v44_v14 }
  0x37   :  { %198 = vmatprep.subr.mxu0 %v282_v0 }
  0x38   :  { %199 = vmatpush3.msra.mxu0 %v43_v15 }
  0x39   :  { %200 = vmatprep.subr.mxu0 %v282_v0 }
  0x3a   :  { %201 = vmatpush3.msra.mxu0 %v42_v16 }
  0x3b   :  { %203 = vmatmul.mubr.f32.vlgmr.msra.gmra.mxu0 %v41_v17 }
  0xfb   :  { %v131_v19 = vpop.f32.mrf.mxu0 }
  0xfc   :  { %v132_v20 = vadd.f32 %v152_v18, %v131_v19 }
  0xfd   :  { %v204_v21 = vpop.f32.mrf.mxu0 }
  0xfe   :  { %135 = vst [vmem:[#allocation7] sm:$0xff] %v132_v20 }
  0xff   :  { %263 = shalt.err (!%p260_p0)
}
 0x100   :  { %145 = dma.vmem_to_hbm [thread:$0]  %s143_s25, 128, %s320_s3, [#allocation4]  }
 0x101   :  { %276 = dma.done.wait [#allocation4], 128  }
 0x102   :  { %277 = vsyncadd [#allocation4], 4294967168 }
 0x103   :  { %149 = vsyncpa [#allocation3], 1 }
 0x104   :  { %150 = vsyncpa [#allocation6], 1 }
 0x105   :  { %151 = vsyncpa [#allocation4], 1 }

</bundles_post_ra>
